<compile_context>
chip_gen: v5e
topology: v5e:2x2
jax: 0.10.0
libtpu: 0.0.40
codegen_flags: <defaults>
</compile_context>

<pallas_src>
import math

import jax
import jax.numpy as jnp
from jax import lax
from jax.experimental import pallas as pl
from jax.experimental.pallas import tpu as pltpu


def _round_up(x, m):
    return ((x + m - 1) // m) * m


def nalu_sinh_kernel(x_ref, wg_ref, y_ref):
    """One batch tile.

    x_ref  : (tb, in_dim)           f32   input tile (real, unpadded K)
    wg_ref : (2*out_pad, in_dim)    f32   rows [0, out_pad)          = W
                                          rows [out_pad, 2*out_pad)  = G
    y_ref  : (tb, out_pad)          f32   output tile (lane-dense)
    """
    out_pad = y_ref.shape[1]

    x = x_ref[...]                                   # (tb, in_dim)
    wg = wg_ref[...]                                 # (2*out_pad, in_dim)

    # asinh(x) = sign(x) * log(|x| + sqrt(x^2 + 1))  (cancellation-safe)
    ax = jnp.abs(x)
    s = jnp.log(ax + jnp.sqrt(ax * ax + 1.0))
    asinh_x = jnp.where(x >= 0.0, s, -s)

    # One N=256 matmul for a and the gate logits (contract last dim of both
    # operands: no transposed copy of W/G is ever materialized).
    res_xg = lax.dot_general(
        x, wg,
        dimension_numbers=(((1,), (1,)), ((), ())),
        preferred_element_type=jnp.float32)          # (tb, 2*out_pad)
    a = res_xg[:, :out_pad]                          # x @ W.T   (lane slice @128)
    g_logit = res_xg[:, out_pad:]                    # x @ G.T   (lane slice @128)

    # Second matmul uses only the W half of the weight slab (static sublane
    # slice of the ref -> free view, no asinh(x)@G.T waste).
    w = wg_ref[:out_pad, :]                          # (out_pad, in_dim)
    m_logit = lax.dot_general(
        asinh_x, w,
        dimension_numbers=(((1,), (1,)), ((), ())),
        preferred_element_type=jnp.float32)          # (tb, out_pad)

    g = jax.nn.sigmoid(g_logit)

    # sinh(z) = 0.5 * (exp(z) - exp(-z))  (no underflow->inf band)
    m = 0.5 * (jnp.exp(m_logit) - jnp.exp(-m_logit))

    # g*a + (1-g)*m  ==  m + g*(a - m)
    y_ref[...] = m + g * (a - m)


def nalu_sinh(x, G, W_hat, M_hat, *, block_b=1024):
    """NALU-sinh forward. x: (B, in_dim); G/W_hat/M_hat: (out_dim, in_dim)."""
    B, in_dim = x.shape
    out_dim = G.shape[0]

    # --- hoisted NAC weight (once per call, not per grid step) -------------
    W = jnp.tanh(W_hat) * jax.nn.sigmoid(M_hat)      # (out_dim, in_dim)

    # Pad only the output/lane dim of the weights (lane-dense stores); the
    # contraction dim stays at the real in_dim.
    out_pad = _round_up(max(out_dim, 128), 128)

    # Combined weight slab [W ; G]; zero rows contribute exactly 0.
    wg = jnp.zeros((2 * out_pad, in_dim), jnp.float32)
    wg = wg.at[:out_dim, :].set(W.astype(jnp.float32))
    wg = wg.at[out_pad:out_pad + out_dim, :].set(G.astype(jnp.float32))

    # Batch tiling: aim for >= 2 grid steps (v7x megacore) when B > 8, while
    # keeping tiles large (block_b) to stay near the HBM roofline on v5e/v6e.
    tb = min(block_b, _round_up(pl.cdiv(B, 2), 8))
    tb = max(8, min(tb, _round_up(B, 8)))
    b_pad = _round_up(B, tb)

    if b_pad != B:
        x_in = jnp.zeros((b_pad, in_dim), jnp.float32).at[:B, :].set(
            x.astype(jnp.float32))
    else:
        x_in = x.astype(jnp.float32)

    grid = (b_pad // tb,)

    y_pad = pl.pallas_call(
        nalu_sinh_kernel,
        out_shape=jax.ShapeDtypeStruct((b_pad, out_pad), jnp.float32),
        grid_spec=pltpu.PrefetchScalarGridSpec(
            num_scalar_prefetch=0,
            grid=grid,
            in_specs=[
                # Last block dim == full array dim -> exempt from 128 rule.
                pl.BlockSpec((tb, in_dim), lambda i: (i, 0)),
                # Constant index_map -> weights resident; single-buffered so
                # the never-changing block does not take 2x VMEM.
                pl.BlockSpec((2 * out_pad, in_dim), lambda i: (0, 0),
                             pipeline_mode=pl.Buffered(1)),
            ],
            out_specs=pl.BlockSpec((tb, out_pad), lambda i: (i, 0)),
        ),
        compiler_params=pltpu.CompilerParams(
            dimension_semantics=("parallel",)),
    )(x_in, wg)

    return y_pad[:B, :out_dim]


def nalu_sinh_ref(x, G, W_hat, M_hat):
    W = jnp.tanh(W_hat) * jax.nn.sigmoid(M_hat)
    a = x @ W.T
    g = jax.nn.sigmoid(x @ G.T)
    m = jnp.sinh(jnp.arcsinh(x) @ W.T)
    return g * a + (1.0 - g) * m


def kaiming_uniform(key, shape, a=math.sqrt(5)):
    # PyTorch kaiming_uniform_ with a=sqrt(5): bound = sqrt(6/((1+a^2)*fan_in))
    fan_in = shape[1]
    gain = math.sqrt(2.0 / (1.0 + a * a))
    bound = gain * math.sqrt(3.0 / fan_in)
    return jax.random.uniform(key, shape, jnp.float32, -bound, bound)


if __name__ == "__main__":
    # Full-precision f32 matmuls for the pure-JAX reference as well.
    jax.config.update("jax_default_matmul_precision", "highest")

    batch, in_dim, out_dim = 8, 32, 16

    key = jax.random.PRNGKey(0)
    kx, kg, kw, km = jax.random.split(key, 4)

    x = jax.random.normal(kx, (batch, in_dim), jnp.float32)
    G = kaiming_uniform(kg, (out_dim, in_dim))
    W_hat = kaiming_uniform(kw, (out_dim, in_dim))
    M_hat = kaiming_uniform(km, (out_dim, in_dim))

    y = jax.block_until_ready(nalu_sinh(x, G, W_hat, M_hat))
    y_ref = nalu_sinh_ref(x, G, W_hat, M_hat)

    assert y.shape == (batch, out_dim)
    assert jnp.allclose(y, y_ref, atol=1e-5, rtol=1e-5), (
        float(jnp.max(jnp.abs(y - y_ref))))
    print("KERNEL_OK")
</pallas_src>

<mosaic_0001>
module attributes {stable_mosaic.version = 11 : i64} {
  func.func @nalu_sinh_kernel(%arg0: i32, %arg1: memref<8x32xf32, #tpu.memory_space<vmem>>, %arg2: memref<256x32xf32, #tpu.memory_space<vmem>>, %arg3: memref<8x128xf32, #tpu.memory_space<vmem>>) attributes {dimension_semantics = [#tpu.dimension_semantics<parallel>], iteration_bounds = array<i64: 1>, scalar_prefetch = 0 : i64, scratch_operands = 0 : i64, tpu.core_type = #tpu.core_type<tc>, window_params = [{transform_indices = @transform_0, window_bounds = array<i64: 8, 32>}, {pipeline_mode = #tpu.pipeline_mode<synchronous>, transform_indices = @transform_1, window_bounds = array<i64: 256, 32>}, {transform_indices = @transform_2, window_bounds = array<i64: 8, 128>}]} {
    %c0 = arith.constant 0 : index
    %c0_0 = arith.constant 0 : index
    %0 = vector.load %arg1[%c0, %c0_0] : memref<8x32xf32, #tpu.memory_space<vmem>>, vector<8x32xf32>
    %c0_1 = arith.constant 0 : index
    %c0_2 = arith.constant 0 : index
    %1 = vector.load %arg2[%c0_1, %c0_2] : memref<256x32xf32, #tpu.memory_space<vmem>>, vector<256x32xf32>
    %2 = math.absf %0 : vector<8x32xf32>
    %3 = arith.mulf %2, %2 : vector<8x32xf32>
    %cst = arith.constant 1.000000e+00 : f32
    %4 = vector.broadcast %cst : f32 to vector<8x32xf32>
    %5 = arith.addf %3, %4 : vector<8x32xf32>
    %6 = math.sqrt %5 : vector<8x32xf32>
    %7 = arith.addf %2, %6 : vector<8x32xf32>
    %8 = math.log %7 : vector<8x32xf32>
    %cst_3 = arith.constant 0.000000e+00 : f32
    %9 = vector.broadcast %cst_3 : f32 to vector<8x32xf32>
    %10 = arith.cmpf oge, %0, %9 : vector<8x32xf32>
    %cst_4 = arith.constant 0.000000e+00 : f32
    %11 = vector.broadcast %cst_4 : f32 to vector<8x32xf32>
    %12 = arith.subf %11, %8 : vector<8x32xf32>
    %13 = arith.select %10, %8, %12 : vector<8x32xi1>, vector<8x32xf32>
    %cst_5 = arith.constant dense<0.000000e+00> : vector<8x256xf32>
    %14 = tpu.matmul %0, %1, %cst_5 {dimension_numbers = #tpu.dot_dimension_numbers<[1], [1], [0], [0], [0, 0, 1, 0], [], []>, precision = #tpu.contract_precision<fp32>} : vector<8x32xf32>, vector<256x32xf32>, vector<8x256xf32> -> vector<8x256xf32>
    %15 = vector.extract_strided_slice %14 {offsets = [0, 0], sizes = [8, 128], strides = [1, 1]} : vector<8x256xf32> to vector<8x128xf32>
    %16 = vector.extract_strided_slice %14 {offsets = [0, 128], sizes = [8, 128], strides = [1, 1]} : vector<8x256xf32> to vector<8x128xf32>
    %c0_6 = arith.constant 0 : index
    %c0_7 = arith.constant 0 : index
    %17 = vector.load %arg2[%c0_6, %c0_7] : memref<256x32xf32, #tpu.memory_space<vmem>>, vector<128x32xf32>
    %cst_8 = arith.constant dense<0.000000e+00> : vector<8x128xf32>
    %18 = tpu.matmul %13, %17, %cst_8 {dimension_numbers = #tpu.dot_dimension_numbers<[1], [1], [0], [0], [0, 0, 1, 0], [], []>, precision = #tpu.contract_precision<fp32>} : vector<8x32xf32>, vector<128x32xf32>, vector<8x128xf32> -> vector<8x128xf32>
    %19 = arith.negf %16 : vector<8x128xf32>
    %20 = math.exp %19 : vector<8x128xf32>
    %cst_9 = arith.constant 1.000000e+00 : f32
    %21 = vector.broadcast %cst_9 : f32 to vector<8x128xf32>
    %22 = arith.addf %21, %20 : vector<8x128xf32>
    %23 = arith.divf %21, %22 : vector<8x128xf32>
    %24 = math.exp %18 : vector<8x128xf32>
    %cst_10 = arith.constant 0.000000e+00 : f32
    %25 = vector.broadcast %cst_10 : f32 to vector<8x128xf32>
    %26 = arith.subf %25, %18 : vector<8x128xf32>
    %27 = math.exp %26 : vector<8x128xf32>
    %28 = arith.subf %24, %27 : vector<8x128xf32>
    %cst_11 = arith.constant 5.000000e-01 : f32
    %29 = vector.broadcast %cst_11 : f32 to vector<8x128xf32>
    %30 = arith.mulf %29, %28 : vector<8x128xf32>
    %31 = arith.subf %15, %30 : vector<8x128xf32>
    %32 = arith.mulf %23, %31 : vector<8x128xf32>
    %33 = arith.addf %30, %32 : vector<8x128xf32>
    %c0_12 = arith.constant 0 : index
    %c0_13 = arith.constant 0 : index
    %34 = vector.load %arg3[%c0_12, %c0_13] : memref<8x128xf32, #tpu.memory_space<vmem>>, vector<8x128xf32>
    tpu.vector_store %arg3[%c0_12, %c0_13], %33 {strides = array<i32>} : memref<8x128xf32, #tpu.memory_space<vmem>>, vector<8x128xf32>,
    return
  }
  func.func @transform_0(%arg0: i32) -> (i32, i32) {
    %c0_i32 = arith.constant 0 : i32
    %c0_i32_0 = arith.constant 0 : i32
    return %arg0, %c0_i32 : i32, i32
  }
  func.func @transform_1(%arg0: i32) -> (i32, i32) {
    %c0_i32 = arith.constant 0 : i32
    %c0_i32_0 = arith.constant 0 : i32
    %c0_i32_1 = arith.constant 0 : i32
    return %c0_i32, %c0_i32_0 : i32, i32
  }
  func.func @transform_2(%arg0: i32) -> (i32, i32) {
    %c0_i32 = arith.constant 0 : i32
    %c0_i32_0 = arith.constant 0 : i32
    return %arg0, %c0_i32 : i32, i32
  }
}

</mosaic_0001>

<bundles_post_ra>
// kernel: tpu_custom_call.1
= control target key start
LH: loop header
LB: loop body
LE: loop exit
PB: predicated region body
PF: predicated region fallthrough
CT: control target
= control target key end

     0   :  { %vm66_vm0 = vcmask 261120   ;;  %s2152_s0 = inlined_call_operand.vmem [shape: f32[8,32], index: 0, kind: input, shape index: {}]   ;;  %s2153_s1 = inlined_call_operand.vmem [shape: f32[256,32], index: 1, kind: input, shape index: {}]   ;;  %s2154_s2 = inlined_call_operand.hbm [shape: f32[8,128], index: 2, kind: output, shape index: {}]  }
   0x1   :  { %v28_v0 = vld [vmem:[%s2153_s1 + $0x78] sm:$0xff]  ;;  %v27_v1 = vld [vmem:[%s2153_s1 + $0x70] sm:$0xff]  ;;  %v26_v2 = vld [vmem:[%s2153_s1 + $0x68] sm:$0xff] }
   0x2   :  { %v116_v3 = vsel %vm66_vm0, %v28_v0, 0  ;;  %v113_v4 = vsel %vm66_vm0, %v27_v1, 0  ;;  %v110_v5 = vsel %vm66_vm0, %v26_v2, 0  ;;  %v25_v6 = vld [vmem:[%s2153_s1 + $0x60] sm:$0xff]  ;;  %v24_v7 = vld [vmem:[%s2153_s1 + $0x58] sm:$0xff]  ;;  %v23_v17 = vld [vmem:[%s2153_s1 + $0x50] sm:$0xff] }
   0x3   :  { %v1376_v8 = vand.u32 4294901760, %v116_v3  ;;  %v1378_v9 = vand.u32 4294901760, %v113_v4  ;;  %v1380_v10 = vand.u32 4294901760, %v110_v5  ;;  %v107_v11 = vsel %vm66_vm0, %v25_v6, 0 }
   0x4   :  { %v1383_v12 = vand.u32 4294901760, %v107_v11  ;;  %v104_v16 = vsel %vm66_vm0, %v24_v7, 0 }
   0x5   :  { %167 = vmatpush.xpose.msra.mxu0 %v1376_v8  ;;  %v1387_v13 = vsub.f32 %v116_v3, %v1376_v8  ;;  %v1390_v14 = vsub.f32 %v113_v4, %v1378_v9  ;;  %v1393_v15 = vsub.f32 %v110_v5, %v1380_v10  ;;  %363 = vmatpush.xpose.msra.mxu3 %v1376_v8 }
   0x6   :  { %7 = vsyncpa [#allocation3], 0  ;;  %v1407_v20 = vand.u32 4294901760, %v104_v16  ;;  %v101_v21 = vsel %vm66_vm0, %v23_v17, 0  ;;  %v1419_v25 = vsub.f32 %v107_v11, %v1383_v12  ;;  %v22_v26 = vld [vmem:[%s2153_s1 + $0x48] sm:$0xff]  ;;  %v21_v34 = vld [vmem:[%s2153_s1 + $0x40] sm:$0xff] }
   0x7   :  { %v1401_v18 = vand.u32 4294901760, %v1387_v13  ;;  %v1404_v19 = vand.u32 4294901760, %v1390_v14  ;;  %310 = vmatpush.xpose.msra.mxu2 %v1387_v13  ;;  %v1416_v24 = vand.u32 4294901760, %v1393_v15  ;;  %v1428_v28 = vand.u32 4294901760, %v101_v21  ;;  %v20_v41 = vld [vmem:[%s2153_s1 + $0x38] sm:$0xff]  ;;  %v19_v48 = vld [vmem:[%s2153_s1 + $0x30] sm:$0xff] }
   0x8   :  { %v98_v29 = vsel %vm66_vm0, %v22_v26, 0  ;;  %v1438_v32 = vand.u32 4294901760, %v1419_v25  ;;  %v1441_v33 = vsub.f32 %v104_v16, %v1407_v20  ;;  %v95_v40 = vsel %vm66_vm0, %v21_v34, 0  ;;  %v18_v54 = vld [vmem:[%s2153_s1 + $0x28] sm:$0xff]  ;;  %v17_v62 = vld [vmem:[%s2153_s1 + $0x20] sm:$0xff]  ;;  %v16_v5 = vld [vmem:[%s2153_s1 + $0x18] sm:$0xff] }
   0x9   :  { %2221 = vst [vmem:[#allocation5_spill] sm:$0xff] %v1401_v18  ;;  %169 = vmatpush.xpose.msra.mxu0 %v1378_v9  ;;  %v210_v22 = vsub.f32 %v1387_v13, %v1401_v18  ;;  %v216_v23 = vsub.f32 %v1390_v14, %v1404_v19  ;;  %365 = vmatpush.xpose.msra.mxu3 %v1378_v9  ;;  %v1448_v35 = vand.u32 4294901760, %v98_v29  ;;  %v1480_v46 = vand.u32 4294901760, %v95_v40  ;;  %s1293_s21 = sshll.u32 %s2154_s2, 4  ;;  %s1294_s21 = int_to_ptr.hbm [resolvable:$true] %s1293_s21 }
   0xa   :  { %2222 = vst [vmem:[#allocation6_spill] sm:$0xff] %v1404_v19  ;;  %v222_v31 = vsub.f32 %v1393_v15, %v1416_v24  ;;  %v228_v37 = vsub.f32 %v1419_v25, %v1438_v32  ;;  %v1457_v38 = vand.u32 4294901760, %v1441_v33  ;;  %v1460_v39 = vsub.f32 %v101_v21, %v1428_v28 }
   0xb   :  { %2223 = vst [vmem:[#allocation7_spill] sm:$0xff] %v1416_v24  ;;  %v1425_v27 = vand.u32 4294901760, %v210_v22  ;;  %313 = vmatpush.xpose.msra.mxu2 %v1390_v14  ;;  %v1433_v30 = vand.u32 4294901760, %v216_v23  ;;  %v1469_v42 = vsub.f32 %v98_v29, %v1448_v35  ;;  %v92_v47 = vsel %vm66_vm0, %v20_v41, 0  ;;  %v15_v22 = vld [vmem:[%s2153_s1 + $0x10] sm:$0xff] }
   0xc   :  { %2224 = vst [vmem:[#allocation8_spill] sm:$0xff] %v1438_v32  ;;  %v1452_v36 = vand.u32 4294901760, %v222_v31  ;;  %v1473_v43 = vand.u32 4294901760, %v228_v37  ;;  %v234_v44 = vsub.f32 %v1441_v33, %v1457_v38  ;;  %v1478_v45 = vand.u32 4294901760, %v1460_v39 }
   0xd   :  { %212 = vmatpush.xpose.msra.mxu1 %v1425_v27  ;;  %171 = vmatpush.xpose.msra.mxu0 %v1380_v10  ;;  %2225 = vst [vmem:[#allocation9_spill] sm:$0xff] %v1457_v38  ;;  %v1489_v49 = vand.u32 4294901760, %v1469_v42  ;;  %v1497_v52 = vand.u32 4294901760, %v92_v47  ;;  %v1500_v53 = vsub.f32 %v95_v40, %v1480_v46  ;;  %v89_v55 = vsel %vm66_vm0, %v19_v48, 0  ;;  %v14_v40 = vld [vmem:[%s2153_s1 + $0x8] sm:$0xff] }
   0xe   :  { %367 = vmatpush.xpose.msra.mxu3 %v1380_v10  ;;  %2226 = vst [vmem:[#allocation10_spill] sm:$0xff] %v1460_v39  ;;  %v1493_v50 = vand.u32 4294901760, %v234_v44  ;;  %v240_v51 = vsub.f32 %v1460_v39, %v1478_v45  ;;  %v86_v57 = vsel %vm66_vm0, %v18_v54, 0  ;;  %v1518_v60 = vand.u32 4294901760, %v89_v55 }
   0xf   :  { %316 = vmatpush.xpose.msra.mxu2 %v1393_v15  ;;  %2227 = vst [vmem:[#allocation11_spill] sm:$0xff] %v1469_v42  ;;  %v246_v56 = vsub.f32 %v1469_v42, %v1489_v49  ;;  %v1516_v59 = vand.u32 4294901760, %v1500_v53  ;;  %v1521_v61 = vsub.f32 %v92_v47, %v1497_v52  ;;  %v1530_v0 = vand.u32 4294901760, %v86_v57 }
  0x10   :  { %2228 = vst [vmem:[#allocation12_spill] sm:$0xff] %v1478_v45  ;;  %v1513_v58 = vand.u32 4294901760, %v240_v51  ;;  %v1540_v3 = vsub.f32 %v89_v55, %v1518_v60  ;;  %v83_v4 = vsel %vm66_vm0, %v17_v62, 0  ;;  %v80_v21 = vsel %vm66_vm0, %v16_v5, 0  ;;  %v13_v55 = vld [vmem:[%s2153_s1] sm:$0xff] }
  0x11   :  { %218 = vmatpush.xpose.msra.mxu1 %v1433_v30  ;;  %173 = vmatpush.xpose.msra.mxu0 %v1383_v12  ;;  %2229 = vst [vmem:[#allocation13_spill] sm:$0xff] %v1489_v49  ;;  %v1528_v63 = vand.u32 4294901760, %v246_v56  ;;  %v252_v1 = vsub.f32 %v1500_v53, %v1516_v59  ;;  %v1537_v2 = vand.u32 4294901760, %v1521_v61  ;;  %v1548_v6 = vand.u32 4294901760, %v83_v4 }
  0x12   :  { %369 = vmatpush.xpose.msra.mxu3 %v1383_v12  ;;  %2230 = vst [vmem:[#allocation14_spill] sm:$0xff] %v1497_v52  ;;  %v1557_v16 = vand.u32 4294901760, %v1540_v3  ;;  %v1560_v17 = vsub.f32 %v86_v57, %v1530_v0  ;;  %v1580_v34 = vand.u32 4294901760, %v80_v21  ;;  %v77_v37 = vsel %vm66_vm0, %v15_v22, 0 }
  0x13   :  { %319 = vmatpush.xpose.msra.mxu2 %v1419_v25  ;;  %2231 = vst [vmem:[#allocation15_spill] sm:$0xff] %v1500_v53  ;;  %v1552_v7 = vand.u32 4294901760, %v252_v1  ;;  %v258_v11 = vsub.f32 %v1521_v61, %v1537_v2  ;;  %v1569_v23 = vsub.f32 %v83_v4, %v1548_v6  ;;  %v1597_v48 = vand.u32 4294901760, %v77_v37 }
  0x14   :  { %2232 = vst [vmem:[#allocation16_spill] sm:$0xff] %v1516_v59  ;;  %v264_v29 = vsub.f32 %v1540_v3, %v1557_v16  ;;  %v1578_v31 = vand.u32 4294901760, %v1560_v17  ;;  %v1600_v51 = vsub.f32 %v80_v21, %v1580_v34  ;;  %v74_v54 = vsel %vm66_vm0, %v14_v40, 0 }
  0x15   :  { %224 = vmatpush.xpose.msra.mxu1 %v1452_v36  ;;  %175 = vmatpush.xpose.msra.mxu0 %v1407_v20  ;;  %2233 = vst [vmem:[#allocation17_spill] sm:$0xff] %v1518_v60  ;;  %v1573_v26 = vand.u32 4294901760, %v258_v11  ;;  %v1589_v41 = vand.u32 4294901760, %v1569_v23  ;;  %v1617_v1 = vand.u32 4294901760, %v74_v54  ;;  %v1620_v4 = vsub.f32 %v77_v37, %v1597_v48 }
  0x16   :  { %371 = vmatpush.xpose.msra.mxu3 %v1407_v20  ;;  %2234 = vst [vmem:[#allocation18_spill] sm:$0xff] %v1521_v61  ;;  %v1593_v44 = vand.u32 4294901760, %v264_v29  ;;  %v270_v47 = vsub.f32 %v1560_v17, %v1578_v31  ;;  %v1615_v62 = vand.u32 4294901760, %v1600_v51  ;;  %v71_v5 = vsel %vm66_vm0, %v13_v55, 0 }
  0x17   :  { %322 = vmatpush.xpose.msra.mxu2 %v1441_v33  ;;  %2235 = vst [vmem:[#allocation19_spill] sm:$0xff] %v1528_v63  ;;  %v276_v56 = vsub.f32 %v1569_v23, %v1589_v41  ;;  %v1632_v22 = vand.u32 4294901760, %v1620_v4  ;;  %v1634_v29 = vand.u32 4294901760, %v71_v5  ;;  %v1637_v37 = vsub.f32 %v74_v54, %v1617_v1 }
  0x18   :  { %2236 = vst [vmem:[#allocation20_spill] sm:$0xff] %v1530_v0  ;;  %v1612_v57 = vand.u32 4294901760, %v270_v47  ;;  %v282_v21 = vsub.f32 %v1600_v51, %v1615_v62 }
  0x19   :  { %230 = vmatpush.xpose.msra.mxu1 %v1473_v43  ;;  %177 = vmatpush.xpose.msra.mxu0 %v1428_v28  ;;  %2237 = vst [vmem:[#allocation21_spill] sm:$0xff] %v1537_v2  ;;  %v1625_v11 = vand.u32 4294901760, %v276_v56  ;;  %v288_v47 = vsub.f32 %v1620_v4, %v1632_v22  ;;  %v1648_v55 = vand.u32 4294901760, %v1637_v37  ;;  %v1651_v56 = vsub.f32 %v71_v5, %v1634_v29 }
  0x1a   :  { %373 = vmatpush.xpose.msra.mxu3 %v1428_v28  ;;  %2238 = vst [vmem:[#allocation22_spill] sm:$0xff] %v1540_v3  ;;  %v1643_v40 = vand.u32 4294901760, %v282_v21 }
  0x1b   :  { %325 = vmatpush.xpose.msra.mxu2 %v1460_v39  ;;  %2239 = vst [vmem:[#allocation23_spill] sm:$0xff] %v1548_v6  ;;  %v1657_v54 = vand.u32 4294901760, %v288_v47  ;;  %v294_v21 = vsub.f32 %v1637_v37, %v1648_v55 }
  0x1c   :  { %2240 = vst [vmem:[#allocation24_spill] sm:$0xff] %v1552_v7 }
  0x1d   :  { %236 = vmatpush.xpose.msra.mxu1 %v1493_v50  ;;  %179 = vmatpush.xpose.msra.mxu0 %v1448_v35  ;;  %2241 = vst [vmem:[#allocation25_spill] sm:$0xff] %v1557_v16  ;;  %v1668_v5 = vand.u32 4294901760, %v294_v21  ;;  %v44_v21 = vld [vmem:[%s2153_s1 + $0xf8] sm:$0xff] }
  0x1e   :  { %375 = vmatpush.xpose.msra.mxu3 %v1448_v35  ;;  %2242 = vst [vmem:[#allocation26_spill] sm:$0xff] %v1560_v17 }
  0x1f   :  { %328 = vmatpush.xpose.msra.mxu2 %v1469_v42  ;;  %2243 = vst [vmem:[#allocation27_spill] sm:$0xff] %v1569_v23 }
  0x20   :  { %2244 = vst [vmem:[#allocation28_spill] sm:$0xff] %v1573_v26 }
  0x21   :  { %242 = vmatpush.xpose.msra.mxu1 %v1513_v58  ;;  %181 = vmatpush.xpose.msra.mxu0 %v1480_v46  ;;  %2245 = vst [vmem:[#allocation29_spill] sm:$0xff] %v1578_v31 }
  0x22   :  { %377 = vmatpush.xpose.msra.mxu3 %v1480_v46  ;;  %2246 = vst [vmem:[#allocation30_spill] sm:$0xff] %v1580_v34 }
  0x23   :  { %331 = vmatpush.xpose.msra.mxu2 %v1500_v53  ;;  %2247 = vst [vmem:[#allocation31_spill] sm:$0xff] %v1589_v41 }
  0x24   :  { %2248 = vst [vmem:[#allocation32_spill] sm:$0xff] %v1593_v44 }
  0x25   :  { %248 = vmatpush.xpose.msra.mxu1 %v1528_v63  ;;  %183 = vmatpush.xpose.msra.mxu0 %v1497_v52  ;;  %2249 = vst [vmem:[#allocation33_spill] sm:$0xff] %v1597_v48 }
  0x26   :  { %379 = vmatpush.xpose.msra.mxu3 %v1497_v52  ;;  %2250 = vst [vmem:[#allocation34_spill] sm:$0xff] %v1600_v51 }
  0x27   :  { %334 = vmatpush.xpose.msra.mxu2 %v1521_v61  ;;  %2251 = vst [vmem:[#allocation35_spill] sm:$0xff] %v1612_v57 }
  0x28   :  { %2252 = vst [vmem:[#allocation36_spill] sm:$0xff] %v1615_v62 }
  0x29   :  { %254 = vmatpush.xpose.msra.mxu1 %v1552_v7  ;;  %185 = vmatpush.xpose.msra.mxu0 %v1518_v60  ;;  %2253 = vst [vmem:[#allocation37_spill] sm:$0xff] %v1617_v1 }
  0x2a   :  { %381 = vmatpush.xpose.msra.mxu3 %v1518_v60  ;;  %2254 = vst [vmem:[#allocation38_spill] sm:$0xff] %v1620_v4 }
  0x2b   :  { %337 = vmatpush.xpose.msra.mxu2 %v1540_v3  ;;  %2255 = vst [vmem:[#allocation39_spill] sm:$0xff] %v1625_v11 }
  0x2c   :  { %2256 = vst [vmem:[#allocation40_spill] sm:$0xff] %v1632_v22 }
  0x2d   :  { %260 = vmatpush.xpose.msra.mxu1 %v1573_v26  ;;  %187 = vmatpush.xpose.msra.mxu0 %v1530_v0  ;;  %2257 = vst [vmem:[#allocation41_spill] sm:$0xff] %v1637_v37 }
  0x2e   :  { %383 = vmatpush.xpose.msra.mxu3 %v1530_v0  ;;  %2258 = vst [vmem:[#allocation42_spill] sm:$0xff] %v1643_v40 }
  0x2f   :  { %340 = vmatpush.xpose.msra.mxu2 %v1560_v17  ;;  %2259 = vst [vmem:[#allocation43_spill] sm:$0xff] %v1648_v55 }
  0x30   :  { %2260 = vst [vmem:[#allocation44_spill] sm:$0xff] %v1651_v56 }
  0x31   :  { %266 = vmatpush.xpose.msra.mxu1 %v1593_v44  ;;  %189 = vmatpush.xpose.msra.mxu0 %v1548_v6  ;;  %2261 = vst [vmem:[#allocation45_spill] sm:$0xff] %v1657_v54 }
  0x32   :  { %385 = vmatpush.xpose.msra.mxu3 %v1548_v6  ;;  %2263 = vst [vmem:[#allocation47_spill] sm:$0xff] %v1668_v5 }
  0x33   :  { %343 = vmatpush.xpose.msra.mxu2 %v1569_v23 }
  0x35   :  { %272 = vmatpush.xpose.msra.mxu1 %v1612_v57  ;;  %191 = vmatpush.xpose.msra.mxu0 %v1580_v34 }
  0x36   :  { %387 = vmatpush.xpose.msra.mxu3 %v1580_v34 }
  0x37   :  { %346 = vmatpush.xpose.msra.mxu2 %v1600_v51  ;;  %v1662_v51 = vand.u32 4294901760, %v1651_v56 }
  0x39   :  { %278 = vmatpush.xpose.msra.mxu1 %v1625_v11  ;;  %193 = vmatpush.xpose.msra.mxu0 %v1597_v48  ;;  %2262 = vst [vmem:[#allocation46_spill] sm:$0xff] %v1662_v51  ;;  %v300_v47 = vsub.f32 %v1651_v56, %v1662_v51 }
  0x3a   :  { %389 = vmatpush.xpose.msra.mxu3 %v1597_v48 }
  0x3b   :  { %349 = vmatpush.xpose.msra.mxu2 %v1620_v4  ;;  %v1676_v4 = vand.u32 4294901760, %v300_v47 }
  0x3d   :  { %284 = vmatpush.xpose.msra.mxu1 %v1643_v40  ;;  %195 = vmatpush.xpose.msra.mxu0 %v1617_v1  ;;  %2264 = vst [vmem:[#allocation48_spill] sm:$0xff] %v1676_v4 }
  0x3e   :  { %391 = vmatpush.xpose.msra.mxu3 %v1617_v1 }
  0x3f   :  { %352 = vmatpush.xpose.msra.mxu2 %v1637_v37  ;;  %v164_v37 = vsel %vm66_vm0, %v44_v21, 0 }
  0x41   :  { %290 = vmatpush.xpose.msra.mxu1 %v1657_v54  ;;  %197 = vmatpush.xpose.msra.mxu0 %v1634_v29 }
  0x42   :  { %393 = vmatpush.xpose.msra.mxu3 %v1634_v29 }
  0x43   :  { %355 = vmatpush.xpose.msra.mxu2 %v1651_v56  ;;  %v43_v56 = vld [vmem:[%s2153_s1 + $0xf0] sm:$0xff] }
  0x45   :  { %404 = vmatpush.xpose.msrb.mxu0 %v1401_v18  ;;  %296 = vmatpush.xpose.msra.mxu1 %v1668_v5  ;;  %v1686_v18 = vand.u32 4294901760, %v164_v37 }
  0x47   :  { %508 = vmatpush.xpose.msrb.mxu2 %v1686_v18  ;;  %v1690_v47 = vsub.f32 %v164_v37, %v1686_v18 }
  0x49   :  { %408 = vmatpush.xpose.msrb.mxu0 %v1404_v19  ;;  %302 = vmatpush.xpose.msra.mxu1 %v1676_v4  ;;  %v161_v19 = vsel %vm66_vm0, %v43_v56, 0  ;;  %v2167_v21 = vand.u32 4294901760, %v1690_v47  ;;  %v42_v56 = vld [vmem:[%s2153_s1 + $0xe8] sm:$0xff] }
  0x4a   :  { %v158_v5 = vsel %vm66_vm0, %v42_v56, 0  ;;  %v41_v56 = vld [vmem:[%s2153_s1 + $0xe0] sm:$0xff] }
  0x4b   :  { %v551_v4 = vsub.f32 %v1690_v47, %v2167_v21  ;;  %v1715_v40 = vand.u32 4294901760, %v158_v5 }
  0x4d   :  { %471 = vmatpush.xpose.msrb.mxu1 %v1376_v8  ;;  %412 = vmatpush.xpose.msrb.mxu0 %v1416_v24  ;;  %v1699_v24 = vand.u32 4294901760, %v161_v19  ;;  %v1722_v21 = vsub.f32 %v158_v5, %v1715_v40  ;;  %v1736_v5 = vld [vmem:[%s2152_s0] sm:$0xff] }
  0x4e   :  { %vm63_vm3 = vcmp.ge.f32.partialorder %v1736_v5, 0.0 }
  0x4f   :  { %510 = vmatpush.xpose.msrb.mxu2 %v1699_v24  ;;  %v1706_v37 = vsub.f32 %v161_v19, %v1699_v24 }
  0x51   :  { %473 = vmatpush.xpose.msrb.mxu1 %v1378_v9  ;;  %416 = vmatpush.xpose.msrb.mxu0 %v1438_v32  ;;  %v552_v32 = vand.u32 4294901760, %v551_v4  ;;  %v2170_v54 = vand.u32 4294901760, %v1706_v37  ;;  %v155_v4 = vsel %vm66_vm0, %v41_v56, 0 }
  0x52   :  { %v1731_v23 = vand.u32 4294901760, %v155_v4 }
  0x53   :  { %553 = vmatpush.xpose.msrb.mxu3 %v552_v32  ;;  %v557_v19 = vsub.f32 %v1706_v37, %v2170_v54  ;;  %512 = vmatpush.xpose.msrb.mxu2 %v1715_v40 }
  0x54   :  { %v1743_v56 = vsub.f32 %v155_v4, %v1731_v23 }
  0x55   :  { %475 = vmatpush.xpose.msrb.mxu1 %v1380_v10  ;;  %420 = vmatpush.xpose.msrb.mxu0 %v1457_v38  ;;  %v558_v32 = vand.u32 4294901760, %v557_v19  ;;  %v2173_v38 = vand.u32 4294901760, %v1722_v21  ;;  %v68_v19 = vsel %vm66_vm0, %v1736_v5, 0 }
  0x56   :  { %v1750_v11 = vand.u32 4294901760, %v68_v19  ;;  %v2177_v17 = vand.u32 4294901760, %v1743_v56 }
  0x57   :  { %559 = vmatpush.xpose.msrb.mxu3 %v558_v32  ;;  %v563_v54 = vsub.f32 %v1722_v21, %v2173_v38  ;;  %514 = vmatpush.xpose.msrb.mxu2 %v1731_v23 }
  0x58   :  { %v1759_v57 = vsub.f32 %v68_v19, %v1750_v11  ;;  %304 = vmatmul.f32.vlgmr.msra.gmra.mxu1 %v1750_v11  ;;  %v569_v3 = vsub.f32 %v1743_v56, %v2177_v17 }
  0x59   :  { %477 = vmatpush.xpose.msrb.mxu1 %v1383_v12  ;;  %424 = vmatpush.xpose.msrb.mxu0 %v1478_v45  ;;  %v40_v45 = vld [vmem:[%s2153_s1 + $0xd8] sm:$0xff]  ;;  %v564_v38 = vand.u32 4294901760, %v563_v54  ;;  %v39_v54 = vld [vmem:[%s2153_s1 + $0xd0] sm:$0xff] }
  0x5a   :  { %v152_v32 = vsel %vm66_vm0, %v40_v45, 0  ;;  %358 = vmatmul.f32.vlgmr.msra.gmra.mxu2 %v1759_v57  ;;  %v1774_v19 = vand.u32 4294901760, %v1759_v57  ;;  %v570_v17 = vand.u32 4294901760, %v569_v3  ;;  %v38_v3 = vld [vmem:[%s2153_s1 + $0xc8] sm:$0xff] }
  0x5b   :  { %v1756_v4 = vand.u32 4294901760, %v152_v32  ;;  %565 = vmatpush.xpose.msrb.mxu3 %v564_v38  ;;  %v149_v38 = vsel %vm66_vm0, %v39_v54, 0  ;;  %v146_v26 = vsel %vm66_vm0, %v38_v3, 0 }
  0x5c   :  { %v201_v44 = vsub.f32 %v1759_v57, %v1774_v19  ;;  %397 = vmatmul.f32.vlgmr.msra.gmra.mxu3 %v1774_v19  ;;  %v1801_v53 = vand.u32 4294901760, %v146_v26 }
  0x5d   :  { %479 = vmatpush.xpose.msrb.mxu1 %v1407_v20  ;;  %428 = vmatpush.xpose.msrb.mxu0 %v1489_v49  ;;  %v1767_v45 = vsub.f32 %v152_v32, %v1756_v4  ;;  %v1780_v32 = vand.u32 4294901760, %v149_v38 }
  0x5e   :  { %516 = vmatpush.xpose.msrb.mxu2 %v1756_v4  ;;  %v1812_v3 = vsub.f32 %v146_v26, %v1801_v53  ;;  %v36_v26 = vld [vmem:[%s2153_s1 + $0xb8] sm:$0xff] }
  0x5f   :  { %v2183_v49 = vand.u32 4294901760, %v1767_v45  ;;  %571 = vmatpush.xpose.msrb.mxu3 %v570_v17  ;;  %v1790_v54 = vsub.f32 %v149_v38, %v1780_v32 }
  0x60   :  { %v2191_v7 = vand.u32 4294901760, %v1812_v3 }
  0x61   :  { %481 = vmatpush.xpose.msrb.mxu1 %v1428_v28  ;;  %432 = vmatpush.xpose.msrb.mxu0 %v1516_v59  ;;  %v575_v61 = vsub.f32 %v1767_v45, %v2183_v49  ;;  %v1795_v59 = vand.u32 4294901760, %v201_v44  ;;  %v2188_v49 = vand.u32 4294901760, %v1790_v54  ;;  %v37_v44 = vld [vmem:[%s2153_s1 + $0xc0] sm:$0xff] }
  0x62   :  { %518 = vmatpush.xpose.msrb.mxu2 %v1780_v32 }
  0x63   :  { %v576_v17 = vand.u32 4294901760, %v575_v61  ;;  %203 = vmatmul.f32.vlgmr.msra.gmra.mxu0 %v1795_v59  ;;  %v581_v38 = vsub.f32 %v1790_v54, %v2188_v49  ;;  %v143_v61 = vsel %vm66_vm0, %v37_v44, 0  ;;  %v587_v44 = vsub.f32 %v1812_v3, %v2191_v7 }
  0x64   :  { %v140_v49 = vsel %vm66_vm0, %v36_v26, 0  ;;  %v35_v26 = vld [vmem:[%s2153_s1 + $0xb0] sm:$0xff] }
  0x65   :  { %483 = vmatpush.xpose.msrb.mxu1 %v1448_v35  ;;  %436 = vmatpush.xpose.msrb.mxu0 %v1537_v2  ;;  %v582_v2 = vand.u32 4294901760, %v581_v38  ;;  %v137_v7 = vsel %vm66_vm0, %v35_v26, 0 }
  0x66   :  { %577 = vmatpush.xpose.msrb.mxu3 %v576_v17  ;;  %520 = vmatpush.xpose.msrb.mxu2 %v1801_v53  ;;  %v1817_v17 = vand.u32 4294901760, %v143_v61 }
  0x68   :  { %v1822_v42 = vsub.f32 %v143_v61, %v1817_v17  ;;  %v588_v61 = vand.u32 4294901760, %v587_v44 }
  0x69   :  { %485 = vmatpush.xpose.msrb.mxu1 %v1480_v46  ;;  %440 = vmatpush.xpose.msrb.mxu0 %v1557_v16  ;;  %v1834_v16 = vand.u32 4294901760, %v140_v49 }
  0x6a   :  { %522 = vmatpush.xpose.msrb.mxu2 %v1817_v17  ;;  %583 = vmatpush.xpose.msrb.mxu3 %v582_v2  ;;  %v2193_v38 = vand.u32 4294901760, %v1822_v42 }
  0x6b   :  { %v1841_v2 = vsub.f32 %v140_v49, %v1834_v16 }
  0x6c   :  { %v593_v63 = vsub.f32 %v1822_v42, %v2193_v38  ;;  %v1850_v38 = vand.u32 4294901760, %v137_v7 }
  0x6d   :  { %487 = vmatpush.xpose.msrb.mxu1 %v1497_v52  ;;  %444 = vmatpush.xpose.msrb.mxu0 %v1578_v31  ;;  %v2197_v31 = vand.u32 4294901760, %v1841_v2 }
  0x6e   :  { %524 = vmatpush.xpose.msrb.mxu2 %v1834_v16  ;;  %589 = vmatpush.xpose.msrb.mxu3 %v588_v61  ;;  %v594_v44 = vand.u32 4294901760, %v593_v63  ;;  %v1857_v52 = vsub.f32 %v137_v7, %v1850_v38  ;;  %v34_v61 = vld [vmem:[%s2153_s1 + $0xa8] sm:$0xff] }
  0x6f   :  { %v599_v49 = vsub.f32 %v1841_v2, %v2197_v31  ;;  %v134_v63 = vsel %vm66_vm0, %v34_v61, 0 }
  0x70   :  { %v1866_v31 = vand.u32 4294901760, %v134_v63 }
  0x71   :  { %489 = vmatpush.xpose.msrb.mxu1 %v1518_v60  ;;  %448 = vmatpush.xpose.msrb.mxu0 %v1589_v41  ;;  %v600_v26 = vand.u32 4294901760, %v599_v49  ;;  %v2201_v41 = vand.u32 4294901760, %v1857_v52 }
  0x72   :  { %526 = vmatpush.xpose.msrb.mxu2 %v1850_v38  ;;  %595 = vmatpush.xpose.msrb.mxu3 %v594_v44  ;;  %v1873_v60 = vsub.f32 %v134_v63, %v1866_v31  ;;  %v33_v44 = vld [vmem:[%s2153_s1 + $0xa0] sm:$0xff] }
  0x73   :  { %v605_v7 = vsub.f32 %v1857_v52, %v2201_v41  ;;  %v131_v49 = vsel %vm66_vm0, %v33_v44, 0 }
  0x74   :  { %v1882_v41 = vand.u32 4294901760, %v131_v49 }
  0x75   :  { %491 = vmatpush.xpose.msrb.mxu1 %v1530_v0  ;;  %452 = vmatpush.xpose.msrb.mxu0 %v1615_v62  ;;  %v606_v61 = vand.u32 4294901760, %v605_v7  ;;  %v2205_v62 = vand.u32 4294901760, %v1873_v60 }
  0x76   :  { %528 = vmatpush.xpose.msrb.mxu2 %v1866_v31  ;;  %601 = vmatpush.xpose.msrb.mxu3 %v600_v26  ;;  %v1889_v0 = vsub.f32 %v131_v49, %v1882_v41  ;;  %v32_v26 = vld [vmem:[%s2153_s1 + $0x98] sm:$0xff] }
  0x77   :  { %v611_v63 = vsub.f32 %v1873_v60, %v2205_v62  ;;  %v128_v7 = vsel %vm66_vm0, %v32_v26, 0 }
  0x78   :  { %v1898_v62 = vand.u32 4294901760, %v128_v7 }
  0x79   :  { %493 = vmatpush.xpose.msrb.mxu1 %v1548_v6  ;;  %456 = vmatpush.xpose.msrb.mxu0 %v1632_v22  ;;  %v612_v44 = vand.u32 4294901760, %v611_v63  ;;  %v2209_v22 = vand.u32 4294901760, %v1889_v0 }
  0x7a   :  { %530 = vmatpush.xpose.msrb.mxu2 %v1882_v41  ;;  %607 = vmatpush.xpose.msrb.mxu3 %v606_v61  ;;  %v1905_v6 = vsub.f32 %v128_v7, %v1898_v62  ;;  %v31_v61 = vld [vmem:[%s2153_s1 + $0x90] sm:$0xff] }
  0x7b   :  { %v617_v49 = vsub.f32 %v1889_v0, %v2209_v22  ;;  %v125_v63 = vsel %vm66_vm0, %v31_v61, 0  ;;  %v30_v61 = vld [vmem:[%s2153_s1 + $0x88] sm:$0xff] }
  0x7c   :  { %v1914_v22 = vand.u32 4294901760, %v125_v63 }
  0x7d   :  { %495 = vmatpush.xpose.msrb.mxu1 %v1580_v34  ;;  %460 = vmatpush.xpose.msrb.mxu0 %v1648_v55  ;;  %v618_v26 = vand.u32 4294901760, %v617_v49  ;;  %v2213_v55 = vand.u32 4294901760, %v1905_v6  ;;  %v122_v49 = vsel %vm66_vm0, %v30_v61, 0 }
  0x7e   :  { %532 = vmatpush.xpose.msrb.mxu2 %v1898_v62  ;;  %613 = vmatpush.xpose.msrb.mxu3 %v612_v44  ;;  %v1922_v44 = vsub.f32 %v125_v63, %v1914_v22 }
  0x7f   :  { %v623_v7 = vsub.f32 %v1905_v6, %v2213_v55  ;;  %v1931_v55 = vand.u32 4294901760, %v122_v49 }
  0x81   :  { %497 = vmatpush.xpose.msrb.mxu1 %v1597_v48  ;;  %464 = vmatpush.xpose.msrb.mxu0 %v1662_v51  ;;  %v624_v51 = vand.u32 4294901760, %v623_v7  ;;  %v2219_v48 = vand.u32 4294901760, %v1922_v44  ;;  %v1939_v34 = vsub.f32 %v122_v49, %v1931_v55 }
  0x82   :  { %534 = vmatpush.xpose.msrb.mxu2 %v1914_v22  ;;  %619 = vmatpush.xpose.msrb.mxu3 %v618_v26  ;;  %v29_v26 = vld [vmem:[%s2153_s1 + $0x80] sm:$0xff]  ;;  %s1342_s1 = smov [#allocation2]  }
  0x83   :  { %v629_v63 = vsub.f32 %v1922_v44, %v2219_v48  ;;  %v119_v7 = vsel %vm66_vm0, %v29_v26, 0  ;;  %v2265_v26 = vand.u32 4294901760, %v1690_v47  ;;  %s1291_s18 = sshll.u32 %s1342_s1, 4  ;;  %s1292_s18 = int_to_ptr.vmem [resolvable:$true] %s1291_s18 }
  0x84   :  { %466 = vmatmul.f32.vlgmr.msrb.gmra.mxu0 %v1750_v11  ;;  %v1947_v39 = vand.u32 4294901760, %v119_v7 }
  0x85   :  { %651 = vmatpush.xpose.msra.mxu0 %v1690_v47  ;;  %499 = vmatpush.xpose.msrb.mxu1 %v1617_v1  ;;  %v630_v61 = vand.u32 4294901760, %v629_v63  ;;  %v2220_v1 = vand.u32 4294901760, %v1939_v34  ;;  %v2267_v47 = vand.u32 4294901760, %v1722_v21 }
  0x86   :  { %536 = vmatpush.xpose.msrb.mxu2 %v1931_v55  ;;  %625 = vmatpush.xpose.msrb.mxu3 %v624_v51  ;;  %v1956_v51 = vsub.f32 %v119_v7, %v1947_v39 }
  0x87   :  { %v635_v49 = vsub.f32 %v1939_v34, %v2220_v1 }
  0x88   :  { %v640_v48 = vand.u32 4294901760, %v1956_v51 }
  0x89   :  { %654 = vmatpush.xpose.msra.mxu0 %v1706_v37  ;;  %501 = vmatpush.xpose.msrb.mxu1 %v1634_v29  ;;  %v636_v63 = vand.u32 4294901760, %v635_v49  ;;  %v2301_v49 = vld [vmem:[#allocation34_spill] sm:$0xff] }
  0x8a   :  { %538 = vmatpush.xpose.msrb.mxu2 %v1947_v39  ;;  %631 = vmatpush.xpose.msrb.mxu3 %v630_v61  ;;  %v641_v1 = vsub.f32 %v1956_v51, %v640_v48  ;;  %v2266_v61 = vand.u32 4294901760, %v1706_v37  ;;  %v2294_v37 = vld [vmem:[#allocation30_spill] sm:$0xff] }
  0x8c   :  { %503 = vmatmul.f32.vlgmr.msrb.gmra.mxu1 %v1750_v11  ;;  %v642_v7 = vand.u32 4294901760, %v641_v1  ;;  %v2271_v1 = vand.u32 4294901760, %v1812_v3 }
  0x8d   :  { %704 = vmatpush.xpose.msra.mxu1 %v1686_v18  ;;  %657 = vmatpush.xpose.msra.mxu0 %v1722_v21  ;;  %v2274_v21 = vand.u32 4294901760, %v1857_v52 }
  0x8e   :  { %745 = vmatpush.xpose.msra.mxu2 %v2265_v26  ;;  %637 = vmatpush.xpose.msrb.mxu3 %v636_v63  ;;  %v2303_v63 = vld [vmem:[#allocation5_spill] sm:$0xff]  ;;  %v2304_v26 = vld [vmem:[#allocation38_spill] sm:$0xff] }
  0x8f   :  { %544 = vmatmul.f32.vlgmr.msrb.gmra.mxu2 %v1795_v59  ;;  %v2268_v59 = vand.u32 4294901760, %v1743_v56 }
  0x91   :  { %706 = vmatpush.xpose.msra.mxu1 %v1699_v24  ;;  %660 = vmatpush.xpose.msra.mxu0 %v1743_v56 }
  0x92   :  { %749 = vmatpush.xpose.msra.mxu2 %v2266_v61  ;;  %643 = vmatpush.xpose.msrb.mxu3 %v642_v7  ;;  %v2305_v7 = vld [vmem:[#allocation47_spill] sm:$0xff]  ;;  %v2306_v61 = vld [vmem:[#allocation6_spill] sm:$0xff] }
  0x95   :  { %708 = vmatpush.xpose.msra.mxu1 %v1715_v40  ;;  %663 = vmatpush.xpose.msra.mxu0 %v1767_v45 }
  0x96   :  { %812 = vmatpush.xpose.msra.mxu3 %v1686_v18  ;;  %753 = vmatpush.xpose.msra.mxu2 %v2267_v47  ;;  %v2269_v18 = vand.u32 4294901760, %v1767_v45  ;;  %v2307_v47 = vld [vmem:[#allocation41_spill] sm:$0xff] }
  0x97   :  { %645 = vmatmul.f32.vlgmr.msrb.gmra.mxu3 %v1750_v11 }
  0x99   :  { %710 = vmatpush.xpose.msra.mxu1 %v1731_v23  ;;  %666 = vmatpush.xpose.msra.mxu0 %v1790_v54 }
  0x9a   :  { %814 = vmatpush.xpose.msra.mxu3 %v1699_v24  ;;  %757 = vmatpush.xpose.msra.mxu2 %v2268_v59  ;;  %v2270_v24 = vand.u32 4294901760, %v1790_v54  ;;  %v2308_v59 = vld [vmem:[#allocation48_spill] sm:$0xff] }
  0x9d   :  { %712 = vmatpush.xpose.msra.mxu1 %v1756_v4  ;;  %669 = vmatpush.xpose.msra.mxu0 %v1812_v3  ;;  %v2298_v3 = vld [vmem:[#allocation27_spill] sm:$0xff] }
  0x9e   :  { %816 = vmatpush.xpose.msra.mxu3 %v1715_v40  ;;  %761 = vmatpush.xpose.msra.mxu2 %v2269_v18  ;;  %v2273_v40 = vand.u32 4294901760, %v1841_v2 }
  0xa1   :  { %714 = vmatpush.xpose.msra.mxu1 %v1780_v32  ;;  %672 = vmatpush.xpose.msra.mxu0 %v1822_v42 }
  0xa2   :  { %818 = vmatpush.xpose.msra.mxu3 %v1731_v23  ;;  %765 = vmatpush.xpose.msra.mxu2 %v2270_v24  ;;  %v2272_v23 = vand.u32 4294901760, %v1822_v42  ;;  %v2275_v42 = vand.u32 4294901760, %v1873_v60  ;;  %v2309_v24 = vld [vmem:[#allocation7_spill] sm:$0xff] }
  0xa5   :  { %716 = vmatpush.xpose.msra.mxu1 %v1801_v53  ;;  %675 = vmatpush.xpose.msra.mxu0 %v1841_v2  ;;  %v2300_v2 = vld [vmem:[#allocation37_spill] sm:$0xff] }
  0xa6   :  { %820 = vmatpush.xpose.msra.mxu3 %v1756_v4  ;;  %769 = vmatpush.xpose.msra.mxu2 %v2271_v1  ;;  %v2295_v4 = vld [vmem:[#allocation26_spill] sm:$0xff]  ;;  %v2310_v1 = vld [vmem:[#allocation44_spill] sm:$0xff] }
  0xa9   :  { %718 = vmatpush.xpose.msra.mxu1 %v1817_v17  ;;  %678 = vmatpush.xpose.msra.mxu0 %v1857_v52  ;;  %v2277_v52 = vand.u32 4294901760, %v1905_v6 }
  0xaa   :  { %822 = vmatpush.xpose.msra.mxu3 %v1780_v32  ;;  %773 = vmatpush.xpose.msra.mxu2 %v2272_v23  ;;  %v2297_v32 = vld [vmem:[#allocation33_spill] sm:$0xff] }
  0xad   :  { %720 = vmatpush.xpose.msra.mxu1 %v1834_v16  ;;  %681 = vmatpush.xpose.msra.mxu0 %v1873_v60  ;;  %v2278_v60 = vand.u32 4294901760, %v1922_v44 }
  0xae   :  { %824 = vmatpush.xpose.msra.mxu3 %v1801_v53  ;;  %777 = vmatpush.xpose.msra.mxu2 %v2273_v40  ;;  %v2276_v53 = vand.u32 4294901760, %v1889_v0  ;;  %v2311_v40 = vld [vmem:[#allocation8_spill] sm:$0xff] }
  0xb1   :  { %722 = vmatpush.xpose.msra.mxu1 %v1850_v38  ;;  %684 = vmatpush.xpose.msra.mxu0 %v1889_v0  ;;  %v2279_v0 = vand.u32 4294901760, %v1939_v34 }
  0xb2   :  { %826 = vmatpush.xpose.msra.mxu3 %v1817_v17  ;;  %781 = vmatpush.xpose.msra.mxu2 %v2274_v21 }
  0xb5   :  { %724 = vmatpush.xpose.msra.mxu1 %v1866_v31  ;;  %687 = vmatpush.xpose.msra.mxu0 %v1905_v6  ;;  %v2040_v6 = vand.u32 2147483647, %v1736_v5 }
  0xb6   :  { %828 = vmatpush.xpose.msra.mxu3 %v1834_v16  ;;  %785 = vmatpush.xpose.msra.mxu2 %v2275_v42 }
  0xb7   :  { %v46_v16 = vmul.f32 %v2040_v6, %v2040_v6 }
  0xb9   :  { %726 = vmatpush.xpose.msra.mxu1 %v1882_v41  ;;  %690 = vmatpush.xpose.msra.mxu0 %v1922_v44 }
  0xba   :  { %830 = vmatpush.xpose.msra.mxu3 %v1850_v38  ;;  %789 = vmatpush.xpose.msra.mxu2 %v2276_v53  ;;  %v2299_v38 = vld [vmem:[#allocation42_spill] sm:$0xff] }
  0xbd   :  { %728 = vmatpush.xpose.msra.mxu1 %v1898_v62  ;;  %693 = vmatpush.xpose.msra.mxu0 %v1939_v34  ;;  %v2288_v34 = vld [vmem:[#allocation20_spill] sm:$0xff] }
  0xbe   :  { %832 = vmatpush.xpose.msra.mxu3 %v1866_v31  ;;  %793 = vmatpush.xpose.msra.mxu2 %v2277_v52  ;;  %v2287_v31 = vld [vmem:[#allocation28_spill] sm:$0xff] }
  0xc1   :  { %730 = vmatpush.xpose.msra.mxu1 %v1914_v22  ;;  %696 = vmatpush.xpose.msra.mxu0 %v1956_v51  ;;  %v2302_v51 = vld [vmem:[#allocation45_spill] sm:$0xff] }
  0xc2   :  { %834 = vmatpush.xpose.msra.mxu3 %v1882_v41  ;;  %797 = vmatpush.xpose.msra.mxu2 %v2278_v60 }
  0xc4   :  { %699 = vmatmul.f32.vlgmr.msra.gmra.mxu0 %v1759_v57  ;;  %v2290_v57 = vld [vmem:[#allocation32_spill] sm:$0xff] }
  0xc5   :  { %916 = vmatpush.xpose.msrb.mxu0 %v1376_v8  ;;  %732 = vmatpush.xpose.msra.mxu1 %v1931_v55 }
  0xc6   :  { %836 = vmatpush.xpose.msra.mxu3 %v1898_v62  ;;  %801 = vmatpush.xpose.msra.mxu2 %v2279_v0  ;;  %v2291_v62 = vld [vmem:[#allocation23_spill] sm:$0xff] }
  0xc9   :  { %918 = vmatpush.xpose.msrb.mxu0 %v1378_v9  ;;  %734 = vmatpush.xpose.msra.mxu1 %v1947_v39 }
  0xca   :  { %838 = vmatpush.xpose.msra.mxu3 %v1914_v22  ;;  %805 = vmatpush.xpose.msra.mxu2 %v640_v48  ;;  %v2289_v48 = vld [vmem:[#allocation18_spill] sm:$0xff] }
  0xcb   :  { %v2292_v22 = vld [vmem:[#allocation22_spill] sm:$0xff] }
  0xcc   :  { %738 = vmatmul.f32.vlgmr.msra.gmra.mxu1 %v1774_v19  ;;  %v2296_v19 = vld [vmem:[#allocation39_spill] sm:$0xff] }
  0xcd   :  { %961 = vmatpush.xpose.msrb.mxu1 %v1425_v27  ;;  %920 = vmatpush.xpose.msrb.mxu0 %v1380_v10  ;;  %v47_v27 = vadd.f32 1.0, %v46_v16  ;;  %v2315_v16 = vld [vmem:[#allocation16_spill] sm:$0xff] }
  0xce   :  { %1059 = vmatpush.xpose.msrb.mxu2 %v1387_v13  ;;  %840 = vmatpush.xpose.msra.mxu3 %v1931_v55  ;;  %v2293_v55 = vld [vmem:[#allocation35_spill] sm:$0xff] }
  0xcf   :  { %807 = vmatmul.f32.vlgmr.msra.gmra.mxu2 %v1750_v11  ;;  %1304 = vrsqrt.f32 %v47_v27  ;;  %vm55_vm1 = vcmp.eq.f32.partialorder %v47_v27, inf  ;;  %v58_v45 = vand.u32 2147483648, %v47_v27  ;;  %vm57_vm2 = vcmp.eq.f32.partialorder %v47_v27, 0.0 }
  0xd1   :  { %967 = vmatpush.xpose.msrb.mxu1 %v1433_v30  ;;  %922 = vmatpush.xpose.msrb.mxu0 %v1383_v12  ;;  %v2281_v30 = vld [vmem:[#allocation19_spill] sm:$0xff] }
  0xd2   :  { %1062 = vmatpush.xpose.msrb.mxu2 %v1390_v14  ;;  %842 = vmatpush.xpose.msra.mxu3 %v1947_v39  ;;  %v2283_v39 = vld [vmem:[#allocation11_spill] sm:$0xff] }
  0xd5   :  { %973 = vmatpush.xpose.msrb.mxu1 %v1452_v36  ;;  %924 = vmatpush.xpose.msrb.mxu0 %v1407_v20  ;;  %v1305_v13 = vpop.eup %1304 }
  0xd6   :  { %1112 = vmatpush.xpose.msrb.mxu3 %v1376_v8  ;;  %1065 = vmatpush.xpose.msrb.mxu2 %v1393_v15  ;;  %v49_v14 = vmul.f32 %v1305_v13, %v47_v27  ;;  %v2280_v15 = vld [vmem:[#allocation10_spill] sm:$0xff] }
  0xd7   :  { %844 = vmatmul.f32.vlgmr.msra.gmra.mxu3 %v1750_v11 }
  0xd8   :  { %v50_v36 = vmul.f32 %v1305_v13, %v49_v14  ;;  %v2323_v14 = vld [vmem:[#allocation46_spill] sm:$0xff] }
  0xd9   :  { %979 = vmatpush.xpose.msrb.mxu1 %v1473_v43  ;;  %926 = vmatpush.xpose.msrb.mxu0 %v1428_v28  ;;  %v2284_v43 = vld [vmem:[#allocation24_spill] sm:$0xff] }
  0xda   :  { %1114 = vmatpush.xpose.msrb.mxu3 %v1378_v9  ;;  %1068 = vmatpush.xpose.msrb.mxu2 %v1419_v25  ;;  %v2282_v25 = vld [vmem:[#allocation14_spill] sm:$0xff] }
  0xdd   :  { %985 = vmatpush.xpose.msrb.mxu1 %v1493_v50  ;;  %928 = vmatpush.xpose.msrb.mxu0 %v1448_v35  ;;  %v51_v50 = vmul.f32 0.5, %v50_v36  ;;  %v359_v36 = vpop.f32.mrf.mxu2 }
  0xde   :  { %1116 = vmatpush.xpose.msrb.mxu3 %v1380_v10  ;;  %1071 = vmatpush.xpose.msrb.mxu2 %v1441_v33  ;;  %v2285_v33 = vld [vmem:[#allocation17_spill] sm:$0xff] }
  0xdf   :  { %v52_v41 = vsub.f32 1.5, %v51_v50 }
  0xe1   :  { %991 = vmatpush.xpose.msrb.mxu1 %v1513_v58  ;;  %930 = vmatpush.xpose.msrb.mxu0 %v1480_v46  ;;  %v2286_v58 = vld [vmem:[#allocation15_spill] sm:$0xff]  ;;  %v53_v11 = vmul.f32 %v1305_v13, %v52_v41  ;;  %v2318_v13 = vld [vmem:[#allocation29_spill] sm:$0xff] }
  0xe2   :  { %1118 = vmatpush.xpose.msrb.mxu3 %v1383_v12  ;;  %1074 = vmatpush.xpose.msrb.mxu2 %v2280_v15  ;;  %v204_v15 = vpop.f32.mrf.mxu0 }
  0xe3   :  { %v54_v56 = vmul.f32 %v53_v11, %v47_v27 }
  0xe5   :  { %997 = vmatpush.xpose.msrb.mxu1 %v2281_v30  ;;  %932 = vmatpush.xpose.msrb.mxu0 %v2282_v25  ;;  %v56_v54 = vsel %vm55_vm1, %v47_v27, %v54_v56  ;;  %v2316_v27 = vld [vmem:[#allocation21_spill] sm:$0xff]  ;;  %v305_v30 = vpop.f32.mrf.mxu1 }
  0xe6   :  { %1120 = vmatpush.xpose.msrb.mxu3 %v1407_v20  ;;  %1077 = vmatpush.xpose.msrb.mxu2 %v2283_v39  ;;  %v59_v17 = vsel %vm57_vm2, %v58_v45, %v56_v54 }
  0xe7   :  { %v60_v44 = vadd.f32 %v59_v17, %v2040_v6 }
  0xe9   :  { %1003 = vmatpush.xpose.msrb.mxu1 %v2284_v43  ;;  %934 = vmatpush.xpose.msrb.mxu0 %v2285_v33  ;;  %1306 = vlog2.f32 %v60_v44  ;;  %v306_v44 = vadd.f32 %v305_v30, %v204_v15 }
  0xea   :  { %1122 = vmatpush.xpose.msrb.mxu3 %v1428_v28  ;;  %1080 = vmatpush.xpose.msrb.mxu2 %v2286_v58 }
  0xed   :  { %1009 = vmatpush.xpose.msrb.mxu1 %v2287_v31  ;;  %936 = vmatpush.xpose.msrb.mxu0 %v2288_v34 }
  0xee   :  { %1124 = vmatpush.xpose.msrb.mxu3 %v1448_v35  ;;  %1083 = vmatpush.xpose.msrb.mxu2 %v2289_v48 }
  0xef   :  { %v1307_v18 = vpop.eup %1306 }
  0xf0   :  { %v62_v23 = vmul.f32 0.6931472, %v1307_v18 }
  0xf1   :  { %1015 = vmatpush.xpose.msrb.mxu1 %v2290_v57  ;;  %938 = vmatpush.xpose.msrb.mxu0 %v2291_v62 }
  0xf2   :  { %1126 = vmatpush.xpose.msrb.mxu3 %v1480_v46  ;;  %1086 = vmatpush.xpose.msrb.mxu2 %v2292_v22  ;;  %v64_v21 = vsub.f32 0.0, %v62_v23 }
  0xf4   :  { %v65_v42 = vsel %vm63_vm3, %v62_v23, %v64_v21 }
  0xf5   :  { %1021 = vmatpush.xpose.msrb.mxu1 %v2293_v55  ;;  %940 = vmatpush.xpose.msrb.mxu0 %v2294_v37  ;;  %v865_v53 = vsel %vm66_vm0, %v65_v42, 0 }
  0xf6   :  { %1128 = vmatpush.xpose.msrb.mxu3 %v2282_v25  ;;  %1089 = vmatpush.xpose.msrb.mxu2 %v2295_v4  ;;  %v947_v52 = vand.u32 4294901760, %v865_v53 }
  0xf8   :  { %v948_v60 = vsub.f32 %v865_v53, %v947_v52 }
  0xf9   :  { %1027 = vmatpush.xpose.msrb.mxu1 %v2296_v19  ;;  %942 = vmatpush.xpose.msrb.mxu0 %v2297_v32 }
  0xfa   :  { %1130 = vmatpush.xpose.msrb.mxu3 %v2285_v33  ;;  %1092 = vmatpush.xpose.msrb.mxu2 %v2298_v3  ;;  %v949_v0 = vand.u32 4294901760, %v948_v60 }
  0xfc   :  { %v950_v6 = vsub.f32 %v948_v60, %v949_v0 }
  0xfd   :  { %1033 = vmatpush.xpose.msrb.mxu1 %v2299_v38  ;;  %944 = vmatpush.xpose.msrb.mxu0 %v2300_v2 }
  0xfe   :  { %1132 = vmatpush.xpose.msrb.mxu3 %v2288_v34  ;;  %1095 = vmatpush.xpose.msrb.mxu2 %v2301_v49  ;;  %v951_v5 = vand.u32 4294901760, %v950_v6 }
 0x101   :  { %1039 = vmatpush.xpose.msrb.mxu1 %v2302_v51  ;;  %946 = vmatpush.xpose.msrb.mxu0 %v1634_v29  ;;  %v467_v39 = vpop.f32.mrf.mxu0 }
 0x102   :  { %1134 = vmatpush.xpose.msrb.mxu3 %v2291_v62  ;;  %1098 = vmatpush.xpose.msrb.mxu2 %v2304_v26 }
 0x104   :  { %952 = vmatmul.f32.vlgmr.msrb.gmra.mxu0 %v951_v5 }
 0x105   :  { %1153 = vmatpush.xpose.msra.mxu0 %v2303_v63  ;;  %1045 = vmatpush.xpose.msrb.mxu1 %v2305_v7 }
 0x106   :  { %1136 = vmatpush.xpose.msrb.mxu3 %v2294_v37  ;;  %1101 = vmatpush.xpose.msrb.mxu2 %v2307_v47 }
 0x109   :  { %1157 = vmatpush.xpose.msra.mxu0 %v2306_v61  ;;  %1051 = vmatpush.xpose.msrb.mxu1 %v2308_v59  ;;  %v504_v43 = vpop.f32.mrf.mxu1  ;;  %v360_v61 = vadd.f32 %v359_v36, %v306_v44 }
 0x10a   :  { %1138 = vmatpush.xpose.msrb.mxu3 %v2297_v32  ;;  %1104 = vmatpush.xpose.msrb.mxu2 %v2310_v1 }
 0x10c   :  { %1053 = vmatmul.f32.vlgmr.msrb.gmra.mxu1 %v947_v52 }
 0x10d   :  { %1220 = vmatpush.xpose.msra.mxu1 %v1376_v8  ;;  %1161 = vmatpush.xpose.msra.mxu0 %v2309_v24  ;;  %v2312_v8 = vld [vmem:[#allocation9_spill] sm:$0xff] }
 0x10e   :  { %1140 = vmatpush.xpose.msrb.mxu3 %v2300_v2  ;;  %1107 = vmatmul.f32.vlgmr.msrb.gmra.mxu2 %v948_v60 }
 0x111   :  { %1222 = vmatpush.xpose.msra.mxu1 %v1378_v9  ;;  %1165 = vmatpush.xpose.msra.mxu0 %v2311_v40  ;;  %v2313_v9 = vld [vmem:[#allocation12_spill] sm:$0xff] }
 0x112   :  { %1142 = vmatpush.xpose.msrb.mxu3 %v1634_v29  ;;  %v545_v50 = vpop.f32.mrf.mxu2 }
 0x115   :  { %1224 = vmatpush.xpose.msra.mxu1 %v1380_v10  ;;  %1169 = vmatpush.xpose.msra.mxu0 %v2312_v8  ;;  %v2314_v10 = vld [vmem:[#allocation13_spill] sm:$0xff] }
 0x116   :  { %1146 = vmatmul.f32.vlgmr.msrb.gmra.mxu3 %v949_v0 }
 0x119   :  { %1226 = vmatpush.xpose.msra.mxu1 %v1383_v12  ;;  %1173 = vmatpush.xpose.msra.mxu0 %v2313_v9  ;;  %v2317_v12 = vld [vmem:[#allocation25_spill] sm:$0xff] }
 0x11d   :  { %1228 = vmatpush.xpose.msra.mxu1 %v1407_v20  ;;  %1177 = vmatpush.xpose.msra.mxu0 %v2314_v10  ;;  %v2319_v20 = vld [vmem:[#allocation31_spill] sm:$0xff] }
 0x121   :  { %1230 = vmatpush.xpose.msra.mxu1 %v1428_v28  ;;  %1181 = vmatpush.xpose.msra.mxu0 %v2315_v16  ;;  %v2320_v28 = vld [vmem:[#allocation36_spill] sm:$0xff] }
 0x125   :  { %1232 = vmatpush.xpose.msra.mxu1 %v1448_v35  ;;  %1185 = vmatpush.xpose.msra.mxu0 %v2316_v27  ;;  %v2321_v35 = vld [vmem:[#allocation40_spill] sm:$0xff] }
 0x129   :  { %1234 = vmatpush.xpose.msra.mxu1 %v1480_v46  ;;  %1189 = vmatpush.xpose.msra.mxu0 %v2317_v12  ;;  %v2322_v46 = vld [vmem:[#allocation43_spill] sm:$0xff] }
 0x12d   :  { %1236 = vmatpush.xpose.msra.mxu1 %v2282_v25  ;;  %1193 = vmatpush.xpose.msra.mxu0 %v2318_v13  ;;  %v398_v25 = vpop.f32.mrf.mxu3 }
 0x12e   :  { %v399_v18 = vadd.f32 %v398_v25, %v360_v61 }
 0x130   :  { %v468_v40 = vadd.f32 %v467_v39, %v399_v18 }
 0x131   :  { %1238 = vmatpush.xpose.msra.mxu1 %v2285_v33  ;;  %1197 = vmatpush.xpose.msra.mxu0 %v2319_v20 }
 0x132   :  { %v505_v60 = vadd.f32 %v504_v43, %v468_v40 }
 0x135   :  { %1240 = vmatpush.xpose.msra.mxu1 %v2288_v34  ;;  %1201 = vmatpush.xpose.msra.mxu0 %v2320_v28  ;;  %v646_v33 = vpop.f32.mrf.mxu3 }
 0x136   :  { %v647_v58 = vadd.f32 %v646_v33, %v545_v50 }
 0x139   :  { %1242 = vmatpush.xpose.msra.mxu1 %v2291_v62  ;;  %1205 = vmatpush.xpose.msra.mxu0 %v2321_v35 }
 0x13d   :  { %1244 = vmatpush.xpose.msra.mxu1 %v2294_v37  ;;  %1209 = vmatpush.xpose.msra.mxu0 %v2322_v46 }
 0x141   :  { %1246 = vmatpush.xpose.msra.mxu1 %v2297_v32  ;;  %1213 = vmatpush.xpose.msra.mxu0 %v2323_v14  ;;  %v700_v31 = vpop.f32.mrf.mxu0 }
 0x142   :  { %v701_v34 = vadd.f32 %v700_v31, %v647_v58 }
 0x144   :  { %1215 = vmatmul.f32.vlgmr.msra.gmra.mxu0 %v947_v52 }
 0x145   :  { %1248 = vmatpush.xpose.msra.mxu1 %v2300_v2 }
 0x149   :  { %1250 = vmatpush.xpose.msra.mxu1 %v1634_v29  ;;  %v739_v41 = vpop.f32.mrf.mxu1 }
 0x14a   :  { %v740_v48 = vadd.f32 %v739_v41, %v701_v34 }
 0x14c   :  { %1252 = vmatmul.f32.vlgmr.msra.gmra.mxu1 %v947_v52 }
 0x152   :  { %v808_v57 = vpop.f32.mrf.mxu2 }
 0x153   :  { %v809_v62 = vadd.f32 %v808_v57, %v740_v48 }
 0x15a   :  { %v845_v11 = vpop.f32.mrf.mxu3 }
 0x15b   :  { %v846_v22 = vadd.f32 %v845_v11, %v809_v62 }
 0x15d   :  { %v1302_v55 = vmul.f32 -1.442695, %v846_v22 }
 0x15f   :  { %1308 = vpow2.f32 %v1302_v55 }
 0x165   :  { %v1309_v29 = vpop.eup %1308 }
 0x166   :  { %v1259_v4 = vadd.f32 1.0, %v1309_v29 }
 0x168   :  { %1310 = vrcp.f32 %v1259_v4  ;;  %vm1265_vm4 = vweird.f32 %v1259_v4  ;;  %v1271_v1 = vand.u32 2147483648, %v1259_v4  ;;  %v1269_v42 = vand.u32 2147483647, %v1259_v4 }
 0x16a   :  { %v1272_v52 = vor.u32 1.1754944e-38, %v1271_v1  ;;  %vm1270_vm7 = vcmp.eq.f32.partialorder %v1269_v42, 8.507059e+37 }
 0x16e   :  { %v1311_v38 = vpop.eup %1310 }
 0x16f   :  { %v1261_v49 = vmul.f32 %v1311_v38, %v1259_v4  ;;  %vm1266_vm5 = vweird.f32 %v1311_v38 }
 0x170   :  { %vm1267_vm6 = vmor %vm1265_vm4, %vm1266_vm5 }
 0x171   :  { %v1262_v47 = vsub.f32 1.0, %v1261_v49 }
 0x173   :  { %v1263_v24 = vmul.f32 %v1311_v38, %v1262_v47 }
 0x175   :  { %v1264_v21 = vadd.f32 %v1311_v38, %v1263_v24 }
 0x177   :  { %v1268_v9 = vsel %vm1267_vm6, %v1311_v38, %v1264_v21 }
 0x178   :  { %v1273_v10 = vsel %vm1270_vm7, %v1272_v52, %v1268_v9 }
 0x181   :  { %v953_v56 = vpop.f32.mrf.mxu0 }
 0x189   :  { %v1054_v37 = vpop.f32.mrf.mxu1 }
 0x18a   :  { %v1055_v45 = vadd.f32 %v1054_v37, %v953_v56 }
 0x191   :  { %v1108_v19 = vpop.f32.mrf.mxu2 }
 0x192   :  { %v1109_v32 = vadd.f32 %v1108_v19, %v1055_v45 }
 0x199   :  { %v1147_v54 = vpop.f32.mrf.mxu3 }
 0x19a   :  { %v1148_v3 = vadd.f32 %v1147_v54, %v1109_v32 }
 0x1c1   :  { %v1216_v17 = vpop.f32.mrf.mxu0 }
 0x1c2   :  { %v1217_v2 = vadd.f32 %v1216_v17, %v1148_v3 }
 0x1c9   :  { %v1253_v51 = vpop.f32.mrf.mxu1 }
 0x1ca   :  { %v1254_v63 = vadd.f32 %v1253_v51, %v1217_v2 }
 0x1cc   :  { %v1275_v26 = vmul.f32 1.442695, %v1254_v63  ;;  %v1277_v7 = vsub.f32 0.0, %v1254_v63 }
 0x1ce   :  { %v1278_v59 = vmul.f32 1.442695, %v1277_v7  ;;  %1312 = vpow2.f32 %v1275_v26 }
 0x1d0   :  { %1314 = vpow2.f32 %v1278_v59 }
 0x1d4   :  { %v1313_v23 = vpop.eup %1312 }
 0x1d6   :  { %v1315_v8 = vpop.eup %1314 }
 0x1d7   :  { %v1280_v53 = vsub.f32 %v1313_v23, %v1315_v8 }
 0x1d9   :  { %v1281_v0 = vmul.f32 0.5, %v1280_v53 }
 0x1db   :  { %v1282_v6 = vsub.f32 %v505_v60, %v1281_v0 }
 0x1dd   :  { %v1283_v5 = vmul.f32 %v1282_v6, %v1273_v10 }
 0x1df   :  { %v1284_v16 = vadd.f32 %v1283_v5, %v1281_v0 }
 0x1e1   :  { %1285 = vst [vmem:[#allocation2] sm:$0xff] %v1284_v16 }
 0x1e2   :  { %1296 = dma.vmem_to_hbm [thread:$0]  %s1292_s18, 128, %s1294_s21, [#allocation3]  }
 0x1e3   :  { %1340 = dma.done.wait [#allocation3], 128  }
 0x1e4   :  { %1341 = vsyncadd [#allocation3], 4294967168 }
 0x1e5   :  { %1301 = vsyncpa [#allocation3], 1 }

</bundles_post_ra>
